<compile_context>
chip_gen: v6e
topology: v6e:2x2x1
jax: 0.10.0
libtpu: 0.0.40
codegen_flags: <defaults>
</compile_context>

<pallas_src>
import functools

import jax
import jax.numpy as jnp
from jax.experimental import pallas as pl
from jax.experimental.pallas import tpu as pltpu

LANE = 128  # TPU lane width; all in-kernel tensors are padded to 128 lanes.


# ---------------------------------------------------------------------------
# Fused two-layer GCN encoder kernel (shared body for single & batched calls)
# ---------------------------------------------------------------------------
def _gcn2_kernel(a_ref, x_ref, p_ref, o_ref, *, f0):
    # a_ref: (N, N)   bf16  normalized adjacency D^-1/2 (A+I) D^-1/2
    # x_ref: (N, F0)  bf16  node features
    # p_ref: (F0+LANE+8, LANE) f32 packed parameter slab:
    #          rows [0, F0)        : W0 zero-padded to 128 cols (layer-0 weight)
    #          rows [F0, F0+LANE)  : W1 zero-padded to 128x128  (layer-1 weight,
    #                                head-mean pre-folded on host)
    #          row  F0+LANE        : b0 zero-padded to 128
    #          row  F0+LANE+1      : b1 zero-padded to 128
    # o_ref: (N, LANE) f32 lane-dense output; valid columns sliced on host.
    a = a_ref[...]
    x = x_ref[...]

    # Static ref slices (zero-cost views). Weights cast to bf16 for the MXU;
    # biases stay f32 and elementwise math stays f32 (v5e VPU/EUP have no bf16).
    w0 = p_ref[0:f0, :].astype(jnp.bfloat16)
    w1 = p_ref[f0:f0 + LANE, :].astype(jnp.bfloat16)
    b0 = p_ref[f0 + LANE:f0 + LANE + 1, :]
    b1 = p_ref[f0 + LANE + 1:f0 + LANE + 2, :]

    # layer 0 (concat=True): tanh(A @ (X @ W0) + b0).
    # X@W0 first so every intermediate is 128-lane dense (the kernel is
    # latency-bound, not FLOP-bound, at this size).
    xw0 = jnp.dot(x, w0, preferred_element_type=jnp.float32)                 # (N,128)
    h0 = jnp.tanh(
        jnp.dot(a, xw0.astype(jnp.bfloat16), preferred_element_type=jnp.float32) + b0)

    # layer 1 (concat=False, head-mean folded into W1 on host):
    # tanh(A @ (H0 @ W1) + b1).  Zero padding keeps padded lanes exactly 0.
    xw1 = jnp.dot(h0.astype(jnp.bfloat16), w1, preferred_element_type=jnp.float32)
    h1 = jnp.dot(a, xw1.astype(jnp.bfloat16), preferred_element_type=jnp.float32)
    o_ref[...] = jnp.tanh(h1 + b1)


def gcn_encoder_fused(a_hat, x, param_slab):
    """Single-graph fused forward: no grid, whole-array VMEM residency, 3 DMAs."""
    n, f0 = x.shape
    kern = functools.partial(_gcn2_kernel, f0=f0)
    return pl.pallas_call(
        kern,
        out_shape=jax.ShapeDtypeStruct((n, LANE), jnp.float32),
        in_specs=[
            pl.BlockSpec(memory_space=pltpu.MemorySpace.VMEM),   # A_hat
            pl.BlockSpec(memory_space=pltpu.MemorySpace.VMEM),   # X
            pl.BlockSpec(memory_space=pltpu.MemorySpace.VMEM),   # packed params
        ],
        out_specs=pl.BlockSpec(memory_space=pltpu.MemorySpace.VMEM),
    )(a_hat.astype(jnp.bfloat16), x.astype(jnp.bfloat16), param_slab)


def gcn_encoder_fused_batched(a_hat_b, x_b, param_slab):
    """B graphs per call (same architecture/params), one grid step per graph.

    The batch axis is "parallel": v7x's two TensorCores split it and the
    per-call DMA/launch overhead is amortized across graphs.
    """
    b, n, f0 = x_b.shape
    kern = functools.partial(_gcn2_kernel, f0=f0)
    return pl.pallas_call(
        kern,
        out_shape=jax.ShapeDtypeStruct((b, n, LANE), jnp.float32),
        grid=(b,),
        in_specs=[
            pl.BlockSpec((None, n, n), lambda i: (i, 0, 0)),     # per-graph A_hat
            pl.BlockSpec((None, n, f0), lambda i: (i, 0, 0)),    # per-graph X
            pl.BlockSpec(param_slab.shape, lambda i: (0, 0)),    # shared params
        ],
        out_specs=pl.BlockSpec((None, n, LANE), lambda i: (i, 0, 0)),
        compiler_params=pltpu.CompilerParams(
            dimension_semantics=("parallel",)),
    )(a_hat_b.astype(jnp.bfloat16), x_b.astype(jnp.bfloat16), param_slab)


# ---------------------------------------------------------------------------
# Host-side glue: params, head-mean folding, param packing, normalized adjacency
# ---------------------------------------------------------------------------
def glorot(key, shape):
    limit = jnp.sqrt(6.0 / (shape[0] + shape[1]))
    return jax.random.uniform(key, shape, jnp.float32, -limit, limit)


def fold_heads_into_weight(w, heads, hid, concat):
    """mean_k(A @ X @ W_k) == A @ X @ mean_k(W_k).

    Exact because GeoLayer.update adds the bias AFTER the head mean.  GeoLayer
    stores W as (in_dim, heads*hid) head-major (it views the transform as
    (N, heads, hid)), which is what this reshape assumes.
    """
    if concat or heads == 1:
        return w
    return w.reshape(w.shape[0], heads, hid).mean(axis=1)


def pack_params(w0, b0, w1, b1):
    """Pack (w0, b0, w1, b1) into one 128-lane f32 slab => one DMA descriptor.

    Zero padding guarantees the padded output lanes stay exactly tanh(0+0)=0.
    """
    f0, d0 = w0.shape
    k1, d1 = w1.shape
    assert d0 <= LANE and d1 <= LANE and k1 <= LANE
    slab = jnp.zeros((f0 + LANE + 8, LANE), jnp.float32)
    slab = slab.at[0:f0, 0:d0].set(w0)
    slab = slab.at[f0:f0 + k1, 0:d1].set(w1)
    slab = slab.at[f0 + LANE, 0:d0].set(b0.reshape(-1))
    slab = slab.at[f0 + LANE + 1, 0:d1].set(b1.reshape(-1))
    return slab


def build_normalized_adjacency(edge_index, num_nodes):
    # Dense D^-1/2 (A+I) D^-1/2, equivalent to GeoLayer att_type='gcn' norm:
    # scatter-ADD of edges (duplicate edges counted, matching scatter_add
    # degree semantics), remove self loops, add them back once.
    a = jnp.zeros((num_nodes, num_nodes), jnp.float32)
    a = a.at[edge_index[0], edge_index[1]].add(1.0)
    eye = jnp.eye(num_nodes, dtype=jnp.float32)
    a = a * (1.0 - eye) + eye
    deg = a.sum(axis=1)
    dinv = jnp.where(deg > 0, 1.0 / jnp.sqrt(deg), 0.0)
    return dinv[:, None] * a * dinv[None, :]


def gcn_encoder_forward(x, a_hat, params):
    # F.dropout(..., training=False) is identity (eval mode).
    # tanh is applied on every layer, including the last (matches the reference
    # forward: output = activation(gnn_layer(output, edge_index_all))).
    p0, p1 = params
    w1 = fold_heads_into_weight(p1["w"], p1["heads"], p1["hid"], p1["concat"])
    slab = pack_params(p0["w"], p0["b"], w1, p1["b"])
    out_padded = gcn_encoder_fused(a_hat, x, slab)
    return out_padded[:, :w1.shape[1]]


if __name__ == "__main__":
    N = 64            # number of nodes
    F0 = 16           # original_feature_num
    # architecture = ['gcn','sum',2,16,'tanh','gcn','sum',1,16,'tanh']
    layer_cfg = [
        dict(in_dim=F0, heads=2, hid=16, concat=True),
        dict(in_dim=32, heads=1, hid=16, concat=False),
    ]

    key = jax.random.PRNGKey(0)
    k_x, k_e, k_w0, k_w1, k_xb = jax.random.split(key, 5)

    # node features
    x = jax.random.normal(k_x, (N, F0), jnp.float32)

    # deterministic graph: undirected ring + a few random chords -> edge_index_all
    src = jnp.arange(N, dtype=jnp.int32)
    dst = (src + 1) % N
    chord_src = jax.random.randint(k_e, (16,), 0, N, jnp.int32)
    chord_dst = (chord_src + 7) % N
    rows = jnp.concatenate([src, dst, chord_src, chord_dst])
    cols = jnp.concatenate([dst, src, chord_dst, chord_src])
    edge_index_all = jnp.stack([rows, cols])                   # [2, num_edges]

    a_hat = build_normalized_adjacency(edge_index_all, N)

    # deterministic parameter init (glorot weights, zero bias — matches GeoLayer)
    params = []
    for cfg, kw in zip(layer_cfg, (k_w0, k_w1)):
        out_dim = cfg["heads"] * cfg["hid"] if cfg["concat"] else cfg["hid"]
        params.append(dict(
            w=glorot(kw, (cfg["in_dim"], cfg["heads"] * cfg["hid"])),
            b=jnp.zeros((1, out_dim), jnp.float32),
            heads=cfg["heads"], hid=cfg["hid"], concat=cfg["concat"],
        ))

    # --- single-graph forward (matches the PyTorch module's forward) --------
    out = gcn_encoder_forward(x, a_hat, params)
    jax.block_until_ready(out)
    assert out.shape == (N, 16) and out.dtype == jnp.float32

    # --- batched throughput path: B graphs per call, parallel grid axis ------
    p0, p1 = params
    w1_f = fold_heads_into_weight(p1["w"], p1["heads"], p1["hid"], p1["concat"])
    slab = pack_params(p0["w"], p0["b"], w1_f, p1["b"])
    B = 4
    x_b = jax.random.normal(k_xb, (B, N, F0), jnp.float32).at[0].set(x)
    a_b = jnp.broadcast_to(a_hat, (B, N, N))
    out_b = gcn_encoder_fused_batched(a_b, x_b, slab)[:, :, :w1_f.shape[1]]
    jax.block_until_ready(out_b)
    assert out_b.shape == (B, N, 16) and out_b.dtype == jnp.float32
    assert bool(jnp.allclose(out_b[0], out, atol=1e-2))

    print("KERNEL_OK")
</pallas_src>

<mosaic_0001>
module attributes {stable_mosaic.version = 11 : i64} {
  func.func @_gcn2_kernel(%arg0: memref<64x64xbf16, #tpu.memory_space<vmem>>, %arg1: memref<64x16xbf16, #tpu.memory_space<vmem>>, %arg2: memref<152x128xf32, #tpu.memory_space<vmem>>, %arg3: memref<64x128xf32, #tpu.memory_space<vmem>>) attributes {dimension_semantics = [], scalar_prefetch = 0 : i64, scratch_operands = 0 : i64, tpu.core_type = #tpu.core_type<tc>} {
    %c0 = arith.constant 0 : index
    %c0_0 = arith.constant 0 : index
    %0 = vector.load %arg0[%c0, %c0_0] : memref<64x64xbf16, #tpu.memory_space<vmem>>, vector<64x64xbf16>
    %c0_1 = arith.constant 0 : index
    %c0_2 = arith.constant 0 : index
    %1 = vector.load %arg1[%c0_1, %c0_2] : memref<64x16xbf16, #tpu.memory_space<vmem>>, vector<64x16xbf16>
    %c0_3 = arith.constant 0 : index
    %c0_4 = arith.constant 0 : index
    %2 = vector.load %arg2[%c0_3, %c0_4] : memref<152x128xf32, #tpu.memory_space<vmem>>, vector<16x128xf32>
    %3 = arith.truncf %2 : vector<16x128xf32> to vector<16x128xbf16>
    %c16 = arith.constant 16 : index
    %c0_5 = arith.constant 0 : index
    %4 = vector.load %arg2[%c16, %c0_5] : memref<152x128xf32, #tpu.memory_space<vmem>>, vector<128x128xf32>
    %5 = arith.truncf %4 : vector<128x128xf32> to vector<128x128xbf16>
    %c144 = arith.constant 144 : index
    %c0_6 = arith.constant 0 : index
    %6 = vector.load %arg2[%c144, %c0_6] : memref<152x128xf32, #tpu.memory_space<vmem>>, vector<1x128xf32>
    %c145 = arith.constant 145 : index
    %c0_7 = arith.constant 0 : index
    %7 = vector.load %arg2[%c145, %c0_7] : memref<152x128xf32, #tpu.memory_space<vmem>>, vector<1x128xf32>
    %cst = arith.constant dense<0.000000e+00> : vector<64x128xf32>
    %8 = tpu.matmul %1, %3, %cst {dimension_numbers = #tpu.dot_dimension_numbers<[1], [0], [0], [1], [0, 0, 1, 1], [], []>} : vector<64x16xbf16>, vector<16x128xbf16>, vector<64x128xf32> -> vector<64x128xf32>
    %9 = arith.truncf %8 : vector<64x128xf32> to vector<64x128xbf16>
    %cst_8 = arith.constant dense<0.000000e+00> : vector<64x128xf32>
    %10 = tpu.matmul %0, %9, %cst_8 {dimension_numbers = #tpu.dot_dimension_numbers<[1], [0], [0], [1], [0, 0, 1, 1], [], []>} : vector<64x64xbf16>, vector<64x128xbf16>, vector<64x128xf32> -> vector<64x128xf32>
    %11 = vector.broadcast %6 : vector<1x128xf32> to vector<64x128xf32>
    %12 = arith.addf %10, %11 : vector<64x128xf32>
    %13 = math.tanh %12 : vector<64x128xf32>
    %14 = arith.truncf %13 : vector<64x128xf32> to vector<64x128xbf16>
    %cst_9 = arith.constant dense<0.000000e+00> : vector<64x128xf32>
    %15 = tpu.matmul %14, %5, %cst_9 {dimension_numbers = #tpu.dot_dimension_numbers<[1], [0], [0], [1], [0, 0, 1, 1], [], []>} : vector<64x128xbf16>, vector<128x128xbf16>, vector<64x128xf32> -> vector<64x128xf32>
    %16 = arith.truncf %15 : vector<64x128xf32> to vector<64x128xbf16>
    %cst_10 = arith.constant dense<0.000000e+00> : vector<64x128xf32>
    %17 = tpu.matmul %0, %16, %cst_10 {dimension_numbers = #tpu.dot_dimension_numbers<[1], [0], [0], [1], [0, 0, 1, 1], [], []>} : vector<64x64xbf16>, vector<64x128xbf16>, vector<64x128xf32> -> vector<64x128xf32>
    %18 = vector.broadcast %7 : vector<1x128xf32> to vector<64x128xf32>
    %19 = arith.addf %17, %18 : vector<64x128xf32>
    %20 = math.tanh %19 : vector<64x128xf32>
    %c0_11 = arith.constant 0 : index
    %c0_12 = arith.constant 0 : index
    %21 = vector.load %arg3[%c0_11, %c0_12] : memref<64x128xf32, #tpu.memory_space<vmem>>, vector<64x128xf32>
    tpu.vector_store %arg3[%c0_11, %c0_12], %20 {strides = array<i32>} : memref<64x128xf32, #tpu.memory_space<vmem>>, vector<64x128xf32>,
    return
  }
}

</mosaic_0001>

<bundles_post_ra>
// kernel: tpu_custom_call.1
= control target key start
LH: loop header
LB: loop body
LE: loop exit
PB: predicated region body
PF: predicated region fallthrough
CT: control target
= control target key end

     0   :  { %8 = vsyncpa [#allocation3], 0  ;;  %s751_s0 = inlined_call_operand.vmem [shape: bf16[64,64], index: 0, kind: input, shape index: {}]   ;;  %s752_s1 = inlined_call_operand.vmem [shape: bf16[64,16], index: 1, kind: input, shape index: {}]   ;;  %s753_s2 = inlined_call_operand.hbm [shape: f32[152,128], index: 2, kind: input, shape index: {}]   ;;  %s754_s3 = inlined_call_operand.hbm [shape: f32[64,128], index: 3, kind: output, shape index: {}]  }
   0x1   :  { %9 = vsyncpa [#allocation4], 0  ;;  %s671_s12 = smov [#allocation2]  }
   0x2   :  { %s19_s13 = sshll.u32 %s671_s12, 4  ;;  %s20_s13 = int_to_ptr.vmem [resolvable:$true] %s19_s13 }
   0x3   :  { %s635_s14 = scalar_lea.vmem %s20_s13, 2432  ;;  %p640_p1 = scmp.lt.s32.totalorder %s20_s13, %s20_s13 }
   0x4   :  { %p636_p0 = scmp.ne.s32.totalorder %s20_s13, %s635_s14  ;;  %p641_p2 = scmp.lt.s32.totalorder %s635_s14, %s635_s14 }
   0x6   :  { %p642_p3 = por %p641_p2, %p640_p1 }
   0x8   :  { %p643_p4 = pnand %p642_p3, %p636_p0 }
   0xa   :  { %646 = shalt.err (!%p643_p4)
}
   0xb   :  { %s672_s15 = smov 128   ;;  %s673_s16 = smov 8  }
   0xc   :  { %25 = dma.hbm_to_vmem [thread:$0]  %s753_s2, 2432, %s20_s13, [#allocation3], %s672_s15, %s672_s15, %s673_s16  }
   0xd   :  { %667 = dma.done.wait [#allocation3], 2432  }
   0xe   :  { %668 = vsyncadd [#allocation3], 4294964864  ;;  %v46_v0 = vld [vmem:[#allocation2] sm:$0xff]  ;;  %v47_v1 = vld [vmem:[#allocation2 + $0x8] sm:$0xff]  ;;  %vm95_vm0 = vcmask 130048   ;;  %vm201_vm1 = vcmask 523264  }
   0xf   :  { %v48_v2 = vpack.c.bf16 %v47_v1, %v46_v0  ;;  %v587_v3 = vld [vmem:[%s752_s1] sm:$0xff]   ;;  %v588_v4 = vld [vmem:[%s752_s1 + $0x8] sm:$0xff]   ;;  %v589_v5 = vld [vmem:[%s752_s1 + $0x10] sm:$0xff]  }
  0x10   :  { %519 = vmatprep.mubr.msk.bf16.mxu0 %vm95_vm0, %v587_v3  ;;  %v590_v6 = vld [vmem:[%s752_s1 + $0x18] sm:$0xff]   ;;  %v591_v7 = vld [vmem:[%s751_s0] sm:$0xff]   ;;  %v64_v9 = vld [vmem:[#allocation2 + $0x88] sm:$0xff] }
  0x11   :  { %517 = vmatprep.subr.bf16.mxu0 %v48_v2  ;;  %535 = vmatprep.mubr.msk.bf16.mxu1 %vm201_vm1, %v591_v7  ;;  %v63_v8 = vld [vmem:[#allocation2 + $0x80] sm:$0xff]  ;;  %v61_v10 = vld [vmem:[#allocation2 + $0x70] sm:$0xff]  ;;  %v62_v12 = vld [vmem:[#allocation2 + $0x78] sm:$0xff] }
  0x12   :  { %518 = vmatpush3.bf16.msra.mxu0 %v48_v2  ;;  %v72_v11 = vpack.c.bf16 %v64_v9, %v63_v8  ;;  %v71_v13 = vpack.c.bf16 %v62_v12, %v61_v10  ;;  %v720_v26 = vld [vmem:[%s751_s0 + $0x8] sm:$0xff]   ;;  %v725_v27 = vld [vmem:[%s751_s0 + $0x10] sm:$0xff]   ;;  %v734_v28 = vld [vmem:[%s751_s0 + $0x18] sm:$0xff]   ;;  %s674_s0 = smov [#allocation5]  }
  0x13   :  { %v59_v29 = vld [vmem:[#allocation2 + $0x60] sm:$0xff]  ;;  %v60_v30 = vld [vmem:[#allocation2 + $0x68] sm:$0xff]  ;;  %v57_v32 = vld [vmem:[#allocation2 + $0x50] sm:$0xff]  ;;  %s450_s6 = sshll.u32 %s674_s0, 4  ;;  %s451_s6 = int_to_ptr.vmem [resolvable:$true] %s450_s6 }
  0x14   :  { %543 = vmatprep.subr.bf16.mxu0 %v72_v11  ;;  %v70_v31 = vpack.c.bf16 %v60_v30, %v59_v29  ;;  %v58_v33 = vld [vmem:[#allocation2 + $0x58] sm:$0xff]  ;;  %v55_v35 = vld [vmem:[#allocation2 + $0x40] sm:$0xff]  ;;  %v56_v36 = vld [vmem:[#allocation2 + $0x48] sm:$0xff]  ;;  %s647_s7 = scalar_lea.vmem %s451_s6, 1024  ;;  %p652_p6 = scmp.lt.s32.totalorder %s451_s6, %s451_s6 }
  0x15   :  { %520 = vmatmul.mubr.msk.bf16.vlgmr.msra.gmra.mxu0 %vm95_vm0, %v588_v4  ;;  %v69_v34 = vpack.c.bf16 %v58_v33, %v57_v32  ;;  %v68_v37 = vpack.c.bf16 %v56_v36, %v55_v35  ;;  %v53_v38 = vld [vmem:[#allocation2 + $0x30] sm:$0xff]  ;;  %v54_v39 = vld [vmem:[#allocation2 + $0x38] sm:$0xff]  ;;  %v51_v41 = vld [vmem:[#allocation2 + $0x20] sm:$0xff]  ;;  %p648_p5 = scmp.ne.s32.totalorder %s451_s6, %s647_s7  ;;  %p653_p7 = scmp.lt.s32.totalorder %s647_s7, %s647_s7 }
  0x16   :  { %523 = vmatprep.mubr.msk.bf16.mxu0 %vm95_vm0, %v589_v5  ;;  %544 = vmatpush3.bf16.msra.mxu0 %v72_v11  ;;  %v67_v40 = vpack.c.bf16 %v54_v39, %v53_v38  ;;  %v52_v42 = vld [vmem:[#allocation2 + $0x28] sm:$0xff]  ;;  %v49_v44 = vld [vmem:[#allocation2 + $0x10] sm:$0xff]  ;;  %v50_v45 = vld [vmem:[#allocation2 + $0x18] sm:$0xff] }
  0x17   :  { %545 = vmatprep.subr.bf16.mxu0 %v71_v13  ;;  %v66_v43 = vpack.c.bf16 %v52_v42, %v51_v41  ;;  %v65_v46 = vpack.c.bf16 %v50_v45, %v49_v44  ;;  %v470_v48 = vld [vmem:[#allocation2 + $0x90] ss:$0 sm:$0xff]  ;;  %p654_p8 = por %p653_p7, %p652_p6 }
  0x19   :  { %p655_p9 = pnand %p654_p8, %p648_p5 }
  0x1a   :  { %546 = vmatpush3.bf16.msra.mxu0 %v71_v13 }
  0x1b   :  { %547 = vmatprep.subr.bf16.mxu0 %v70_v31 }
  0x1d   :  { %524 = vmatmul.mubr.msk.bf16.gmra.mxu0 %vm95_vm0, %v590_v6 }
  0x1e   :  { %548 = vmatpush3.bf16.msra.mxu0 %v70_v31 }
  0x1f   :  { %549 = vmatprep.subr.bf16.mxu0 %v69_v34 }
  0x22   :  { %550 = vmatpush3.bf16.msra.mxu0 %v69_v34 }
  0x23   :  { %551 = vmatprep.subr.bf16.mxu0 %v68_v37 }
  0x26   :  { %552 = vmatpush3.bf16.msra.mxu0 %v68_v37 }
  0x27   :  { %553 = vmatprep.subr.bf16.mxu0 %v67_v40 }
  0x2a   :  { %554 = vmatpush3.bf16.msra.mxu0 %v67_v40 }
  0x2b   :  { %555 = vmatprep.subr.bf16.mxu0 %v66_v43 }
  0x2e   :  { %556 = vmatpush3.bf16.msra.mxu0 %v66_v43 }
  0x2f   :  { %557 = vmatprep.subr.bf16.mxu0 %v65_v46 }
  0x32   :  { %558 = vmatpush3.bf16.msra.mxu0 %v65_v46 }
  0xd5   :  { %v521_v14 = vpop.f32.mrf.mxu0 }
  0xd7   :  { %v142_v15 = vpop.f32.mrf.mxu0 }
  0xd9   :  { %v522_v16 = vpop.f32.mrf.mxu0 }
  0xda   :  { %v174_v24 = vpack.c.bf16 %v522_v16, %v521_v14 }
  0xdb   :  { %v145_v17 = vpop.f32.mrf.mxu0 }
  0xdc   :  { %v173_v25 = vpack.c.bf16 %v145_v17, %v142_v15 }
  0xdd   :  { %v525_v18 = vpop.f32.mrf.mxu0 }
  0xdf   :  { %v158_v19 = vpop.f32.mrf.mxu0 }
  0xe1   :  { %v526_v20 = vpop.f32.mrf.mxu0 }
  0xe2   :  { %v176_v21 = vpack.c.bf16 %v526_v20, %v525_v18 }
  0xe3   :  { %v161_v22 = vpop.f32.mrf.mxu0 }
  0xe4   :  { %v175_v23 = vpack.c.bf16 %v161_v22, %v158_v19  ;;  %527 = vmatprep.subr.bf16.mxu1 %v176_v21 }
  0xe5   :  { %528 = vmatpush3.bf16.msra.mxu1 %v176_v21 }
  0xe6   :  { %529 = vmatprep.subr.bf16.mxu1 %v175_v23 }
  0xe9   :  { %530 = vmatpush3.bf16.msra.mxu1 %v175_v23 }
  0xea   :  { %531 = vmatprep.subr.bf16.mxu1 %v174_v24 }
  0xed   :  { %532 = vmatpush3.bf16.msra.mxu1 %v174_v24  ;;  %v479_v24 = vld [vmem:[#allocation2 + $0x91] ss:$0 sm:$0xff] }
  0xee   :  { %533 = vmatprep.subr.bf16.mxu1 %v173_v25 }
  0xf1   :  { %534 = vmatpush3.bf16.msra.mxu1 %v173_v25 }
  0xf4   :  { %536 = vmatmul.mubr.msk.bf16.vlgmr.msra.gmra.mxu1 %vm201_vm1, %v720_v26 }
  0xf5   :  { %539 = vmatprep.mubr.msk.bf16.mxu1 %vm201_vm1, %v725_v27 }
  0xfc   :  { %540 = vmatmul.mubr.msk.bf16.gmra.mxu1 %vm201_vm1, %v734_v28 }
  0xfd   :  { %575 = vmatprep.mubr.msk.bf16.mxu1 %vm201_vm1, %v591_v7 }
 0x1b4   :  { %v537_v47 = vpop.f32.mrf.mxu1 }
 0x1b5   :  { %v257_v53 = vadd.f32 %v537_v47, %v470_v48 }
 0x1b6   :  { %v248_v49 = vpop.f32.mrf.mxu1 }
 0x1b7   :  { %v249_v50 = vadd.f32 %v470_v48, %v248_v49 }
 0x1b8   :  { %v538_v51 = vpop.f32.mrf.mxu1 }
 0x1b9   :  { %v260_v52 = vadd.f32 %v538_v51, %v470_v48  ;;  %595 = vtanh.f32 %v249_v50 }
 0x1ba   :  { %v251_v54 = vpop.f32.mrf.mxu1 }
 0x1bb   :  { %v252_v55 = vadd.f32 %v470_v48, %v251_v54  ;;  %597 = vtanh.f32 %v260_v52 }
 0x1bc   :  { %v541_v56 = vpop.f32.mrf.mxu1 }
 0x1bd   :  { %599 = vtanh.f32 %v252_v55  ;;  %v273_v61 = vadd.f32 %v541_v56, %v470_v48 }
 0x1be   :  { %601 = vtanh.f32 %v257_v53  ;;  %v264_v57 = vpop.f32.mrf.mxu1 }
 0x1bf   :  { %v265_v58 = vadd.f32 %v470_v48, %v264_v57 }
 0x1c0   :  { %v542_v59 = vpop.f32.mrf.mxu1 }
 0x1c1   :  { %v276_v60 = vadd.f32 %v542_v59, %v470_v48  ;;  %603 = vtanh.f32 %v265_v58 }
 0x1c2   :  { %v267_v62 = vpop.f32.mrf.mxu1 }
 0x1c3   :  { %v268_v63 = vadd.f32 %v470_v48, %v267_v62  ;;  %605 = vtanh.f32 %v276_v60 }
 0x1c5   :  { %607 = vtanh.f32 %v268_v63 }
 0x1c6   :  { %609 = vtanh.f32 %v273_v61  ;;  %v596_v0 = vpop.eup %595 }
 0x1c8   :  { %v598_v1 = vpop.eup %597 }
 0x1ca   :  { %v600_v2 = vpop.eup %599 }
 0x1cb   :  { %v602_v3 = vpop.eup %601  ;;  %v287_v4 = vpack.c.bf16 %v600_v2, %v596_v0 }
 0x1cc   :  { %v288_v5 = vpack.c.bf16 %v598_v1, %v602_v3 }
 0x1cd   :  { %559 = vmatprep.mubr.bf16.mxu0 %v287_v4 }
 0x1ce   :  { %560 = vmatmul.mubr.bf16.vlgmr.msra.gmra.mxu0 %v288_v5  ;;  %v604_v6 = vpop.eup %603 }
 0x1d0   :  { %v606_v7 = vpop.eup %605 }
 0x1d2   :  { %v608_v8 = vpop.eup %607 }
 0x1d3   :  { %v610_v9 = vpop.eup %609  ;;  %v289_v10 = vpack.c.bf16 %v608_v8, %v604_v6 }
 0x1d4   :  { %v290_v11 = vpack.c.bf16 %v606_v7, %v610_v9 }
 0x1d5   :  { %563 = vmatprep.mubr.bf16.mxu0 %v289_v10 }
 0x1d6   :  { %564 = vmatmul.mubr.bf16.gmra.mxu0 %v290_v11 }
 0x28e   :  { %v561_v12 = vpop.f32.mrf.mxu0 }
 0x290   :  { %v325_v13 = vpop.f32.mrf.mxu0 }
 0x292   :  { %v562_v14 = vpop.f32.mrf.mxu0 }
 0x293   :  { %v357_v22 = vpack.c.bf16 %v562_v14, %v561_v12 }
 0x294   :  { %v328_v15 = vpop.f32.mrf.mxu0 }
 0x295   :  { %v356_v23 = vpack.c.bf16 %v328_v15, %v325_v13 }
 0x296   :  { %v565_v16 = vpop.f32.mrf.mxu0 }
 0x298   :  { %v341_v17 = vpop.f32.mrf.mxu0 }
 0x29a   :  { %v566_v18 = vpop.f32.mrf.mxu0 }
 0x29b   :  { %v359_v19 = vpack.c.bf16 %v566_v18, %v565_v16 }
 0x29c   :  { %v344_v20 = vpop.f32.mrf.mxu0 }
 0x29d   :  { %v358_v21 = vpack.c.bf16 %v344_v20, %v341_v17  ;;  %567 = vmatprep.subr.bf16.mxu1 %v359_v19 }
 0x29e   :  { %568 = vmatpush3.bf16.msra.mxu1 %v359_v19 }
 0x29f   :  { %569 = vmatprep.subr.bf16.mxu1 %v358_v21 }
 0x2a2   :  { %570 = vmatpush3.bf16.msra.mxu1 %v358_v21 }
 0x2a3   :  { %571 = vmatprep.subr.bf16.mxu1 %v357_v22 }
 0x2a6   :  { %572 = vmatpush3.bf16.msra.mxu1 %v357_v22 }
 0x2a7   :  { %573 = vmatprep.subr.bf16.mxu1 %v356_v23 }
 0x2aa   :  { %574 = vmatpush3.bf16.msra.mxu1 %v356_v23 }
 0x2ad   :  { %576 = vmatmul.mubr.msk.bf16.vlgmr.msra.gmra.mxu1 %vm201_vm1, %v720_v26 }
 0x2ae   :  { %579 = vmatprep.mubr.msk.bf16.mxu1 %vm201_vm1, %v725_v27 }
 0x2b5   :  { %580 = vmatmul.mubr.msk.bf16.gmra.mxu1 %vm201_vm1, %v734_v28 }
 0x36d   :  { %v577_v25 = vpop.f32.mrf.mxu1 }
 0x36e   :  { %v407_v29 = vadd.f32 %v577_v25, %v479_v24 }
 0x36f   :  { %v398_v30 = vpop.f32.mrf.mxu1 }
 0x370   :  { %611 = vtanh.f32 %v407_v29  ;;  %v399_v31 = vadd.f32 %v479_v24, %v398_v30 }
 0x371   :  { %v578_v32 = vpop.f32.mrf.mxu1 }
 0x372   :  { %613 = vtanh.f32 %v399_v31  ;;  %v410_v33 = vadd.f32 %v578_v32, %v479_v24 }
 0x373   :  { %v401_v34 = vpop.f32.mrf.mxu1 }
 0x374   :  { %615 = vtanh.f32 %v410_v33  ;;  %v402_v35 = vadd.f32 %v479_v24, %v401_v34 }
 0x375   :  { %v581_v36 = vpop.f32.mrf.mxu1 }
 0x376   :  { %617 = vtanh.f32 %v402_v35  ;;  %v423_v26 = vadd.f32 %v581_v36, %v479_v24 }
 0x377   :  { %v414_v37 = vpop.f32.mrf.mxu1 }
 0x378   :  { %619 = vtanh.f32 %v423_v26  ;;  %v415_v27 = vadd.f32 %v479_v24, %v414_v37 }
 0x379   :  { %v582_v38 = vpop.f32.mrf.mxu1 }
 0x37a   :  { %621 = vtanh.f32 %v415_v27  ;;  %v426_v28 = vadd.f32 %v582_v38, %v479_v24 }
 0x37b   :  { %v417_v39 = vpop.f32.mrf.mxu1 }
 0x37c   :  { %623 = vtanh.f32 %v426_v28  ;;  %v418_v40 = vadd.f32 %v479_v24, %v417_v39 }
 0x37d   :  { %v612_v41 = vpop.eup %611 }
 0x37e   :  { %439 = vst [vmem:[#allocation5 + $0x10] sm:$0xff] %v612_v41  ;;  %625 = vtanh.f32 %v418_v40 }
 0x37f   :  { %v614_v42 = vpop.eup %613 }
 0x380   :  { %437 = vst [vmem:[#allocation5] sm:$0xff] %v614_v42 }
 0x381   :  { %v616_v43 = vpop.eup %615 }
 0x382   :  { %440 = vst [vmem:[#allocation5 + $0x18] sm:$0xff] %v616_v43 }
 0x383   :  { %v618_v44 = vpop.eup %617 }
 0x384   :  { %438 = vst [vmem:[#allocation5 + $0x8] sm:$0xff] %v618_v44 }
 0x385   :  { %v620_v45 = vpop.eup %619 }
 0x386   :  { %443 = vst [vmem:[#allocation5 + $0x30] sm:$0xff] %v620_v45 }
 0x387   :  { %v622_v46 = vpop.eup %621 }
 0x388   :  { %441 = vst [vmem:[#allocation5 + $0x20] sm:$0xff] %v622_v46 }
 0x389   :  { %v624_v47 = vpop.eup %623 }
 0x38a   :  { %444 = vst [vmem:[#allocation5 + $0x38] sm:$0xff] %v624_v47 }
 0x38b   :  { %v626_v48 = vpop.eup %625 }
 0x38c   :  { %442 = vst [vmem:[#allocation5 + $0x28] sm:$0xff] %v626_v48 }
 0x38d   :  { %658 = shalt.err (!%p655_p9)
}
 0x38e   :  { %456 = dma.vmem_to_hbm [thread:$0]  %s451_s6, 1024, %s754_s3, [#allocation4], %s672_s15, %s672_s15, %s673_s16  }
 0x38f   :  { %669 = dma.done.wait [#allocation4], 1024  }
 0x390   :  { %670 = vsyncadd [#allocation4], 4294966272 }
 0x391   :  { %460 = vsyncpa [#allocation3], 1 }
 0x392   :  { %461 = vsyncpa [#allocation4], 1 }

</bundles_post_ra>
